<compile_context>
chip_gen: v6e
topology: v6e:2x2x1
jax: 0.10.0
libtpu: 0.0.40
codegen_flags: <defaults>
</compile_context>

<pallas_src>
import functools

import jax
import jax.numpy as jnp
from jax.experimental import pallas as pl
from jax.experimental.pallas import tpu as pltpu


def _conv_bn_skip_relu_kernel(x_ref, w_ref, shift_ref, o_ref, *, W, HW, HWp, nb):
    # x_ref    : (nb, Cin, HWp)   f32   NCHW input, spatial flattened (lane-dense)
    # w_ref    : (Cout, 9*Cin)    bf16  folded weights, tap-major (dy, dx), cin-minor
    # shift_ref: (Cout, 1)        f32   folded BatchNorm shift
    # o_ref    : (nb, Cout, HWp)  lane-dense output slab
    Cin = x_ref.shape[1]

    # Replicate-padding edge masks, built ONCE at full operand shape (Cin, HWp)
    # (JAX doesn't CSE broadcast_in_dim, so don't re-broadcast inside the tap loop).
    pos = jax.lax.broadcasted_iota(jnp.int32, (Cin, HWp), 1)
    col = jax.lax.rem(pos, jnp.full_like(pos, W))
    first_col = col == 0
    last_col = col == W - 1
    first_row = pos < W
    last_row = pos >= HW - W          # also covers any padded lanes >= HW (harmless)

    def shifted(v, offset):
        # out[:, p] = v[:, p + offset] (cyclic; every wrap position is exactly an
        # edge-masked position, so the caller's jnp.where turns it into replicate).
        return pltpu.roll(v, (-offset) % HWp, axis=1)

    # Build the 9 replicate-padded taps per image, stack them along sublanes
    # (tap-major, cin-minor) and lane-concatenate across the nb images so the whole
    # 3x3 conv (+ BN scale + 1x1 skip, folded into w_ref) is ONE MXU matmul.
    stacks = []
    for n in range(nb):
        x = x_ref[n]                                          # (Cin, HWp) f32
        left = jnp.where(first_col, x, shifted(x, -1))        # x[h, clamp(w-1)]
        right = jnp.where(last_col, x, shifted(x, +1))        # x[h, clamp(w+1)]
        taps = []
        for oy in (-1, 0, 1):                                 # dy = 0, 1, 2
            for base in (left, x, right):                     # dx = 0, 1, 2
                if oy == -1:
                    taps.append(jnp.where(first_row, base, shifted(base, -W)))
                elif oy == 1:
                    taps.append(jnp.where(last_row, base, shifted(base, +W)))
                else:
                    taps.append(base)
        stacks.append(jnp.concatenate(taps, axis=0))          # (9*Cin, HWp)
    stack = stacks[0] if nb == 1 else jnp.concatenate(stacks, axis=1)   # (9*Cin, nb*HWp)

    # Single K = 9*Cin matmul, bf16 operands, f32 accumulation.
    acc = jnp.dot(w_ref[...], stack.astype(jnp.bfloat16),
                  preferred_element_type=jnp.float32)         # (Cout, nb*HWp)

    # BN shift + ReLU epilogue, lane-dense (128-multiple) per-image stores.
    y = jnp.maximum(acc + shift_ref[...], 0.0)
    for n in range(nb):
        o_ref[n] = y[:, n * HWp:(n + 1) * HWp].astype(o_ref.dtype)


def conv_layer_forward(x_nchw, w3, w1, gamma, beta, running_mean, running_var,
                       eps=1e-5, out_dtype=jnp.float32, num_blocks=None):
    """Fused ConvLayer forward. x_nchw: (N, Cin, H, W) f32 -> (N, Cout, H, W) out_dtype."""
    N, Cin, H, W = x_nchw.shape
    Cout = w3.shape[-1]
    HW = H * W
    HWp = 128 * pl.cdiv(HW, 128)      # keep output stores unmasked for any H*W

    # Fold BatchNorm (eval mode) and the 1x1 skip conv into the 3x3 weights:
    #   relu(scale * (w3 (*) x) + shift + w1 . x)
    #     == relu(((scale*w3) with centre tap += w1) (*) x + shift)
    # NOTE: scale is applied to w3 BEFORE adding w1 (skip is not BN-normalized).
    inv_std = 1.0 / jnp.sqrt(running_var.astype(jnp.float32) + eps)
    scale = gamma.astype(jnp.float32) * inv_std                      # (Cout,)
    shift = beta.astype(jnp.float32) - running_mean.astype(jnp.float32) * scale

    w3f = w3.astype(jnp.float32) * scale.reshape(1, 1, 1, Cout)      # (3,3,Cin,Cout)
    w3f = w3f.at[1, 1].add(w1.astype(jnp.float32))                   # fold skip into centre
    # (3,3,Cin,Cout) -> (Cout, 9*Cin), tap-major (dy,dx), cin-minor — matches kernel order.
    w_flat = jnp.transpose(w3f.reshape(9, Cin, Cout), (2, 0, 1)).reshape(Cout, 9 * Cin)
    w_flat = w_flat.astype(jnp.bfloat16)
    shift2d = shift.reshape(Cout, 1).astype(jnp.float32)

    # Activations stay f32 (taps built in f32; cast to bf16 once inside the kernel).
    x_flat = x_nchw.reshape(N, Cin, HW).astype(jnp.float32)
    if HWp != HW:
        x_flat = jnp.pad(x_flat, ((0, 0), (0, 0), (0, HWp - HW)))

    # Grid sizing: 1 block total on single-TC chips (v5e/v6e) so the overhead-bound
    # per-step pipeline cost is paid once; 2 blocks on v7x so both TCs do one step each.
    if num_blocks is None:
        kind = jax.devices()[0].device_kind.lower()
        num_blocks = 2 if "v7" in kind else 1
    if N % num_blocks != 0 or num_blocks < 1:
        num_blocks = 1
    nb = N // num_blocks

    kernel = functools.partial(_conv_bn_skip_relu_kernel, W=W, HW=HW, HWp=HWp, nb=nb)
    out_flat = pl.pallas_call(
        kernel,
        out_shape=jax.ShapeDtypeStruct((N, Cout, HWp), out_dtype),
        grid_spec=pltpu.PrefetchScalarGridSpec(
            num_scalar_prefetch=0,
            grid=(num_blocks,),
            in_specs=[
                pl.BlockSpec((nb, Cin, HWp), lambda b: (b, 0, 0)),   # activations
                pl.BlockSpec((Cout, 9 * Cin), lambda b: (0, 0)),     # folded weights
                pl.BlockSpec((Cout, 1), lambda b: (0, 0)),           # BN shift
            ],
            out_specs=pl.BlockSpec((nb, Cout, HWp), lambda b: (b, 0, 0)),
        ),
        compiler_params=pltpu.CompilerParams(
            dimension_semantics=("parallel",)),                      # shards across TCs
    )(x_flat, w_flat, shift2d)

    out = out_flat[..., :HW] if HWp != HW else out_flat
    return out.reshape(N, Cout, H, W)                                # free metadata reshape


def conv_layer_reference(x_nchw, w3, w1, gamma, beta, running_mean, running_var,
                         eps=1e-5):
    """Pure-JAX unfused reference (XLA conv) with the original module semantics."""
    Cout = w3.shape[-1]
    x = jnp.transpose(x_nchw, (0, 2, 3, 1))
    xpad = jnp.pad(x, ((0, 0), (1, 1), (1, 1), (0, 0)), mode="edge")
    conv = jax.lax.conv_general_dilated(
        xpad, w3, window_strides=(1, 1), padding="VALID",
        dimension_numbers=("NHWC", "HWIO", "NHWC"))
    inv_std = 1.0 / jnp.sqrt(running_var + eps)
    y = conv * (gamma * inv_std).reshape(1, 1, 1, Cout) + \
        (beta - running_mean * gamma * inv_std).reshape(1, 1, 1, Cout)
    y = y + jnp.einsum("nhwc,co->nhwo", x, w1)
    y = jnp.maximum(y, 0.0)
    return jnp.transpose(y, (0, 3, 1, 2))


if __name__ == "__main__":
    N, Cin, H, W = 2, 4, 16, 16
    Cout = 8

    key = jax.random.PRNGKey(0)
    kx, kw3, kw1 = jax.random.split(key, 3)

    x = jax.random.normal(kx, (N, Cin, H, W), jnp.float32)
    w3 = 0.1 * jax.random.normal(kw3, (3, 3, Cin, Cout), jnp.float32)   # HWIO
    w1 = 0.1 * jax.random.normal(kw1, (Cin, Cout), jnp.float32)
    gamma = jnp.ones((Cout,), jnp.float32)
    beta = jnp.zeros((Cout,), jnp.float32)
    running_mean = jnp.zeros((Cout,), jnp.float32)
    running_var = jnp.ones((Cout,), jnp.float32)

    out = conv_layer_forward(x, w3, w1, gamma, beta, running_mean, running_var)
    out = jax.block_until_ready(out)

    # Reference on bf16-quantized inputs (the kernel feeds bf16 operands to the MXU
    # with an f32 accumulator); tolerance covers fold-then-quantize vs quantize-then-fold.
    xq = x.astype(jnp.bfloat16).astype(jnp.float32)
    w3q = w3.astype(jnp.bfloat16).astype(jnp.float32)
    w1q = w1.astype(jnp.bfloat16).astype(jnp.float32)
    ref = conv_layer_reference(xq, w3q, w1q, gamma, beta, running_mean, running_var)

    assert out.shape == (N, Cout, H, W), out.shape
    max_err = float(jnp.max(jnp.abs(out - ref)))
    assert jnp.allclose(out, ref, atol=3e-2, rtol=3e-2), f"mismatch vs reference: {max_err}"

    print("KERNEL_OK")
</pallas_src>

<mosaic_0001>
module attributes {stable_mosaic.version = 11 : i64} {
  func.func @_conv_bn_skip_relu_kernel(%arg0: i32, %arg1: memref<2x4x256xf32, #tpu.memory_space<vmem>>, %arg2: memref<8x36xbf16, #tpu.memory_space<vmem>>, %arg3: memref<8x1xf32, #tpu.memory_space<vmem>>, %arg4: memref<2x8x256xf32, #tpu.memory_space<vmem>>) attributes {dimension_semantics = [#tpu.dimension_semantics<parallel>], iteration_bounds = array<i64: 1>, scalar_prefetch = 0 : i64, scratch_operands = 0 : i64, tpu.core_type = #tpu.core_type<tc>, window_params = [{transform_indices = @transform_0, window_bounds = array<i64: 2, 4, 256>}, {pipeline_mode = #tpu.pipeline_mode<synchronous>, transform_indices = @transform_1, window_bounds = array<i64: 8, 36>}, {pipeline_mode = #tpu.pipeline_mode<synchronous>, transform_indices = @transform_2, window_bounds = array<i64: 8, 1>}, {transform_indices = @transform_3, window_bounds = array<i64: 2, 8, 256>}]} {
    %0 = tpu.iota {dimensions = array<i32: 1>} : vector<4x256xi32>
    %c16_i32 = arith.constant 16 : i32
    %1 = vector.broadcast %c16_i32 : i32 to vector<4x256xi32>
    %2 = arith.remsi %0, %1 : vector<4x256xi32>
    %c0_i32 = arith.constant 0 : i32
    %3 = vector.broadcast %c0_i32 : i32 to vector<4x256xi32>
    %4 = arith.cmpi eq, %2, %3 : vector<4x256xi32>
    %c15_i32 = arith.constant 15 : i32
    %5 = vector.broadcast %c15_i32 : i32 to vector<4x256xi32>
    %6 = arith.cmpi eq, %2, %5 : vector<4x256xi32>
    %c16_i32_0 = arith.constant 16 : i32
    %7 = vector.broadcast %c16_i32_0 : i32 to vector<4x256xi32>
    %8 = arith.cmpi slt, %0, %7 : vector<4x256xi32>
    %c240_i32 = arith.constant 240 : i32
    %9 = vector.broadcast %c240_i32 : i32 to vector<4x256xi32>
    %10 = arith.cmpi sge, %0, %9 : vector<4x256xi32>
    %c0 = arith.constant 0 : index
    %c0_1 = arith.constant 0 : index
    %c0_2 = arith.constant 0 : index
    %11 = vector.load %arg1[%c0, %c0_1, %c0_2] : memref<2x4x256xf32, #tpu.memory_space<vmem>>, vector<1x4x256xf32>
    %12 = vector.shape_cast %11 : vector<1x4x256xf32> to vector<4x256xf32>
    %c1_i32 = arith.constant 1 : i32
    %13 = tpu.dynamic_rotate %12 by %c1_i32 dim 1 : vector<4x256xf32>, i32 -> vector<4x256xf32>
    %14 = arith.select %4, %12, %13 : vector<4x256xi1>, vector<4x256xf32>
    %c255_i32 = arith.constant 255 : i32
    %15 = tpu.dynamic_rotate %12 by %c255_i32 dim 1 : vector<4x256xf32>, i32 -> vector<4x256xf32>
    %16 = arith.select %6, %12, %15 : vector<4x256xi1>, vector<4x256xf32>
    %c16_i32_3 = arith.constant 16 : i32
    %17 = tpu.dynamic_rotate %14 by %c16_i32_3 dim 1 : vector<4x256xf32>, i32 -> vector<4x256xf32>
    %18 = arith.select %8, %14, %17 : vector<4x256xi1>, vector<4x256xf32>
    %c16_i32_4 = arith.constant 16 : i32
    %19 = tpu.dynamic_rotate %12 by %c16_i32_4 dim 1 : vector<4x256xf32>, i32 -> vector<4x256xf32>
    %20 = arith.select %8, %12, %19 : vector<4x256xi1>, vector<4x256xf32>
    %c16_i32_5 = arith.constant 16 : i32
    %21 = tpu.dynamic_rotate %16 by %c16_i32_5 dim 1 : vector<4x256xf32>, i32 -> vector<4x256xf32>
    %22 = arith.select %8, %16, %21 : vector<4x256xi1>, vector<4x256xf32>
    %c240_i32_6 = arith.constant 240 : i32
    %23 = tpu.dynamic_rotate %14 by %c240_i32_6 dim 1 : vector<4x256xf32>, i32 -> vector<4x256xf32>
    %24 = arith.select %10, %14, %23 : vector<4x256xi1>, vector<4x256xf32>
    %c240_i32_7 = arith.constant 240 : i32
    %25 = tpu.dynamic_rotate %12 by %c240_i32_7 dim 1 : vector<4x256xf32>, i32 -> vector<4x256xf32>
    %26 = arith.select %10, %12, %25 : vector<4x256xi1>, vector<4x256xf32>
    %c240_i32_8 = arith.constant 240 : i32
    %27 = tpu.dynamic_rotate %16 by %c240_i32_8 dim 1 : vector<4x256xf32>, i32 -> vector<4x256xf32>
    %28 = arith.select %10, %16, %27 : vector<4x256xi1>, vector<4x256xf32>
    %29 = tpu.concatenate %18, %20, %22, %14, %12, %16, %24, %26, %28 in 0 : vector<4x256xf32>, vector<4x256xf32>, vector<4x256xf32>, vector<4x256xf32>, vector<4x256xf32>, vector<4x256xf32>, vector<4x256xf32>, vector<4x256xf32>, vector<4x256xf32> -> vector<36x256xf32>
    %c1 = arith.constant 1 : index
    %c0_9 = arith.constant 0 : index
    %c0_10 = arith.constant 0 : index
    %30 = vector.load %arg1[%c1, %c0_9, %c0_10] : memref<2x4x256xf32, #tpu.memory_space<vmem>>, vector<1x4x256xf32>
    %31 = vector.shape_cast %30 : vector<1x4x256xf32> to vector<4x256xf32>
    %c1_i32_11 = arith.constant 1 : i32
    %32 = tpu.dynamic_rotate %31 by %c1_i32_11 dim 1 : vector<4x256xf32>, i32 -> vector<4x256xf32>
    %33 = arith.select %4, %31, %32 : vector<4x256xi1>, vector<4x256xf32>
    %c255_i32_12 = arith.constant 255 : i32
    %34 = tpu.dynamic_rotate %31 by %c255_i32_12 dim 1 : vector<4x256xf32>, i32 -> vector<4x256xf32>
    %35 = arith.select %6, %31, %34 : vector<4x256xi1>, vector<4x256xf32>
    %c16_i32_13 = arith.constant 16 : i32
    %36 = tpu.dynamic_rotate %33 by %c16_i32_13 dim 1 : vector<4x256xf32>, i32 -> vector<4x256xf32>
    %37 = arith.select %8, %33, %36 : vector<4x256xi1>, vector<4x256xf32>
    %c16_i32_14 = arith.constant 16 : i32
    %38 = tpu.dynamic_rotate %31 by %c16_i32_14 dim 1 : vector<4x256xf32>, i32 -> vector<4x256xf32>
    %39 = arith.select %8, %31, %38 : vector<4x256xi1>, vector<4x256xf32>
    %c16_i32_15 = arith.constant 16 : i32
    %40 = tpu.dynamic_rotate %35 by %c16_i32_15 dim 1 : vector<4x256xf32>, i32 -> vector<4x256xf32>
    %41 = arith.select %8, %35, %40 : vector<4x256xi1>, vector<4x256xf32>
    %c240_i32_16 = arith.constant 240 : i32
    %42 = tpu.dynamic_rotate %33 by %c240_i32_16 dim 1 : vector<4x256xf32>, i32 -> vector<4x256xf32>
    %43 = arith.select %10, %33, %42 : vector<4x256xi1>, vector<4x256xf32>
    %c240_i32_17 = arith.constant 240 : i32
    %44 = tpu.dynamic_rotate %31 by %c240_i32_17 dim 1 : vector<4x256xf32>, i32 -> vector<4x256xf32>
    %45 = arith.select %10, %31, %44 : vector<4x256xi1>, vector<4x256xf32>
    %c240_i32_18 = arith.constant 240 : i32
    %46 = tpu.dynamic_rotate %35 by %c240_i32_18 dim 1 : vector<4x256xf32>, i32 -> vector<4x256xf32>
    %47 = arith.select %10, %35, %46 : vector<4x256xi1>, vector<4x256xf32>
    %48 = tpu.concatenate %37, %39, %41, %33, %31, %35, %43, %45, %47 in 0 : vector<4x256xf32>, vector<4x256xf32>, vector<4x256xf32>, vector<4x256xf32>, vector<4x256xf32>, vector<4x256xf32>, vector<4x256xf32>, vector<4x256xf32>, vector<4x256xf32> -> vector<36x256xf32>
    %49 = tpu.concatenate %29, %48 in 1 : vector<36x256xf32>, vector<36x256xf32> -> vector<36x512xf32>
    %c0_19 = arith.constant 0 : index
    %c0_20 = arith.constant 0 : index
    %50 = vector.load %arg2[%c0_19, %c0_20] : memref<8x36xbf16, #tpu.memory_space<vmem>>, vector<8x36xbf16>
    %51 = arith.truncf %49 : vector<36x512xf32> to vector<36x512xbf16>
    %cst = arith.constant dense<0.000000e+00> : vector<8x512xf32>
    %52 = tpu.matmul %50, %51, %cst {dimension_numbers = #tpu.dot_dimension_numbers<[1], [0], [0], [1], [0, 0, 1, 1], [], []>} : vector<8x36xbf16>, vector<36x512xbf16>, vector<8x512xf32> -> vector<8x512xf32>
    %c0_21 = arith.constant 0 : index
    %c0_22 = arith.constant 0 : index
    %53 = vector.load %arg3[%c0_21, %c0_22] : memref<8x1xf32, #tpu.memory_space<vmem>>, vector<8x1xf32>
    %54 = vector.broadcast %53 : vector<8x1xf32> to vector<8x512xf32>
    %55 = arith.addf %52, %54 : vector<8x512xf32>
    %cst_23 = arith.constant 0.000000e+00 : f32
    %56 = vector.broadcast %cst_23 : f32 to vector<8x512xf32>
    %57 = arith.maximumf %55, %56 : vector<8x512xf32>
    %58 = vector.extract_strided_slice %57 {offsets = [0, 0], sizes = [8, 256], strides = [1, 1]} : vector<8x512xf32> to vector<8x256xf32>
    %c0_24 = arith.constant 0 : index
    %c0_25 = arith.constant 0 : index
    %c0_26 = arith.constant 0 : index
    %59 = vector.load %arg4[%c0_24, %c0_25, %c0_26] : memref<2x8x256xf32, #tpu.memory_space<vmem>>, vector<1x8x256xf32>
    %60 = vector.shape_cast %59 : vector<1x8x256xf32> to vector<8x256xf32>
    %61 = vector.shape_cast %58 : vector<8x256xf32> to vector<1x8x256xf32>
    tpu.vector_store %arg4[%c0_24, %c0_25, %c0_26], %61 {strides = array<i32>} : memref<2x8x256xf32, #tpu.memory_space<vmem>>, vector<1x8x256xf32>,
    %62 = vector.extract_strided_slice %57 {offsets = [0, 256], sizes = [8, 256], strides = [1, 1]} : vector<8x512xf32> to vector<8x256xf32>
    %c1_27 = arith.constant 1 : index
    %c0_28 = arith.constant 0 : index
    %c0_29 = arith.constant 0 : index
    %63 = vector.load %arg4[%c1_27, %c0_28, %c0_29] : memref<2x8x256xf32, #tpu.memory_space<vmem>>, vector<1x8x256xf32>
    %64 = vector.shape_cast %63 : vector<1x8x256xf32> to vector<8x256xf32>
    %65 = vector.shape_cast %62 : vector<8x256xf32> to vector<1x8x256xf32>
    tpu.vector_store %arg4[%c1_27, %c0_28, %c0_29], %65 {strides = array<i32>} : memref<2x8x256xf32, #tpu.memory_space<vmem>>, vector<1x8x256xf32>,
    return
  }
  func.func @transform_0(%arg0: i32) -> (i32, i32, i32) {
    %c0_i32 = arith.constant 0 : i32
    %c0_i32_0 = arith.constant 0 : i32
    %c0_i32_1 = arith.constant 0 : i32
    return %arg0, %c0_i32, %c0_i32_0 : i32, i32, i32
  }
  func.func @transform_1(%arg0: i32) -> (i32, i32) {
    %c0_i32 = arith.constant 0 : i32
    %c0_i32_0 = arith.constant 0 : i32
    %c0_i32_1 = arith.constant 0 : i32
    return %c0_i32, %c0_i32_0 : i32, i32
  }
  func.func @transform_2(%arg0: i32) -> (i32, i32) {
    %c0_i32 = arith.constant 0 : i32
    %c0_i32_0 = arith.constant 0 : i32
    %c0_i32_1 = arith.constant 0 : i32
    return %c0_i32, %c0_i32_0 : i32, i32
  }
  func.func @transform_3(%arg0: i32) -> (i32, i32, i32) {
    %c0_i32 = arith.constant 0 : i32
    %c0_i32_0 = arith.constant 0 : i32
    %c0_i32_1 = arith.constant 0 : i32
    return %arg0, %c0_i32, %c0_i32_0 : i32, i32, i32
  }
}

</mosaic_0001>

<bundles_post_ra>
// kernel: tpu_custom_call.1
= control target key start
LH: loop header
LB: loop body
LE: loop exit
PB: predicated region body
PF: predicated region fallthrough
CT: control target
= control target key end

     0   :  { %8 = vsyncpa [#allocation3], 0  ;;  %s860_s0 = inlined_call_operand.hbm [shape: f32[2,4,256], index: 0, kind: input, shape index: {}]   ;;  %s861_s1 = inlined_call_operand.vmem [shape: bf16[8,36], index: 1, kind: input, shape index: {}]   ;;  %s862_s2 = inlined_call_operand.vmem [shape: f32[8,1], index: 2, kind: input, shape index: {}]   ;;  %s863_s3 = inlined_call_operand.hbm [shape: f32[2,8,256], index: 3, kind: output, shape index: {}]  }
   0x1   :  { %9 = vsyncpa [#allocation4], 0  ;;  %s545_s12 = smov [#allocation2]  }
   0x2   :  { %s15_s13 = sshll.u32 %s545_s12, 4  ;;  %s16_s13 = int_to_ptr.vmem [resolvable:$true] %s15_s13 }
   0x3   :  { %s509_s14 = scalar_lea.vmem %s16_s13, 256  ;;  %p514_p1 = scmp.lt.s32.totalorder %s16_s13, %s16_s13 }
   0x4   :  { %p510_p0 = scmp.ne.s32.totalorder %s16_s13, %s509_s14  ;;  %p515_p2 = scmp.lt.s32.totalorder %s509_s14, %s509_s14 }
   0x6   :  { %p516_p3 = por %p515_p2, %p514_p1 }
   0x8   :  { %p517_p4 = pnand %p516_p3, %p510_p0 }
   0xa   :  { %520 = shalt.err (!%p517_p4)
}
   0xb   :  { %s546_s15 = smov 128   ;;  %s547_s16 = smov 8  }
   0xc   :  { %21 = dma.hbm_to_vmem [thread:$0]  %s860_s0, 256, %s16_s13, [#allocation3], %s546_s15, %s546_s15, %s547_s16  }
   0xd   :  { %541 = dma.done.wait [#allocation3], 256  }
   0xe   :  { %542 = vsyncadd [#allocation3], 4294967040  ;;  %v578_v0 = vld [vmem:[#allocation2] sm:$0xff]  ;;  %v580_v1 = vld [vmem:[#allocation2 + $0x8] sm:$0xff]  ;;  %s548_s19 = smov 127   ;;  %s549_s0 = smov 1   ;;  %v30_v6 = vlaneseq }
   0xf   :  { %v584_v2 = vcombine.high %v578_v0, %v578_v0  ;;  %v588_v3 = vcombine.high %v580_v1, %v580_v1  ;;  %s550_s20 = smov 112   ;;  %s551_s21 = smov 16   ;;  %v552_v57 = vmov 0   ;;  %v273_v58 = vld [vmem:[%s862_s2] sm:$0xff]  ;;  %vm150_vm8 = vcmask 1043456  }
  0x10   :  { %v598_v7 = vand.u32 127, %v30_v6  ;;  %328 = vmatprep.mubr.bf16.mxu0 %v552_v57  ;;  %369 = vmatprep.mubr.bf16.mxu1 %v552_v57  ;;  %vm283_vm10 = vcmask 1041408   ;;  %vm279_vm11 = vcmask 293888  }
  0x11   :  { %v418_v4 = vpack.i.bf16 %v584_v2, %v578_v0  ;;  %v423_v5 = vpack.i.bf16 %v588_v3, %v580_v1  ;;  %498 = vset.pattern.permute.xlu0 %v552_v57 }
  0x12   :  { %v601_v8 = vadd.s32 128, %v598_v7  ;;  %v37_v9 = vand.u32 15, %v598_v7  ;;  %vm72_vm0 = vcmp.lt.s32.totalorder %v598_v7, 127  ;;  %vm63_vm1 = vcmp.lt.s32.totalorder %v598_v7, 1 }
  0x13   :  { %419 = vrot.lane.b32.xlu0 %v418_v4, %s548_s19  ;;  %429 = vrot.lane.b32.xlu1 %v418_v4, %s549_s0  ;;  %vm105_vm6 = vcmp.lt.s32.totalorder %v598_v7, 112  ;;  %vm51_vm9 = vcmp.lt.s32.totalorder %v598_v7, 16 }
  0x14   :  { %v44_v10 = vand.u32 15, %v601_v8  ;;  %vm607_vm2 = vcmp.eq.s32.totalorder %v37_v9, 15  ;;  %vm615_vm4 = vcmp.eq.s32.totalorder %v37_v9, 0  ;;  %vm54_vm7 = vcmp.ge.s32.totalorder %v601_v8, 240 }
  0x16   :  { %vm611_vm3 = vcmp.eq.s32.totalorder %v44_v10, 15  ;;  %vm619_vm5 = vcmp.eq.s32.totalorder %v44_v10, 0 }
  0x17   :  { %424 = vrot.lane.b32.xlu0 %v423_v5, %s548_s19  ;;  %434 = vrot.lane.b32.xlu1 %v423_v5, %s549_s0 }
  0x1b   :  { %439 = vrot.lane.b32.xlu0 %v418_v4, %s550_s20  ;;  %444 = vrot.lane.b32.xlu1 %v423_v5, %s550_s20 }
  0x1f   :  { %449 = vrot.lane.b32.xlu0 %v418_v4, %s551_s21  ;;  %454 = vrot.lane.b32.xlu1 %v423_v5, %s551_s21 }
  0x85   :  { %v420_v11 = vpop.permute.xlu0 %419  ;;  %v430_v12 = vpop.permute.xlu1 %429 }
  0x86   :  { %v422_v17 = vunpack.i.h.bf16 %v420_v11  ;;  %v421_v18 = vunpack.i.l.bf16 %v420_v11  ;;  %v432_v19 = vunpack.i.h.bf16 %v430_v12  ;;  %v431_v20 = vunpack.i.l.bf16 %v430_v12 }
  0x88   :  { %v73_v21 = vsel %vm72_vm0, %v421_v18, %v422_v17  ;;  %v74_v22 = vsel %vm72_vm0, %v422_v17, %v421_v18  ;;  %v64_v23 = vsel %vm63_vm1, %v431_v20, %v432_v19  ;;  %v65_v24 = vsel %vm63_vm1, %v432_v19, %v431_v20 }
  0x89   :  { %v425_v25 = vpop.permute.xlu0 %424  ;;  %v634_v26 = vsel %vm607_vm2, %v578_v0, %v73_v21  ;;  %v639_v27 = vsel %vm611_vm3, %v584_v2, %v74_v22  ;;  %v435_v28 = vpop.permute.xlu1 %434  ;;  %v644_v29 = vsel %vm615_vm4, %v578_v0, %v65_v24  ;;  %v649_v30 = vsel %vm619_vm5, %v584_v2, %v64_v23 }
  0x8a   :  { %v427_v31 = vunpack.i.h.bf16 %v425_v25  ;;  %v426_v32 = vunpack.i.l.bf16 %v425_v25  ;;  %v458_v33 = vpack.i.bf16 %v639_v27, %v634_v26  ;;  %v437_v34 = vunpack.i.h.bf16 %v435_v28 }
  0x8b   :  { %v436_v35 = vunpack.i.l.bf16 %v435_v28  ;;  %v468_v38 = vpack.i.bf16 %v649_v30, %v644_v29  ;;  %v141_v60 = vrot.slane %v639_v27, 4  ;;  %v140_v62 = vrot.slane %v634_v26, 4 }
  0x8c   :  { %v176_v36 = vsel %vm72_vm0, %v426_v32, %v427_v31  ;;  %v177_v37 = vsel %vm72_vm0, %v427_v31, %v426_v32  ;;  %459 = vrot.lane.b32.xlu0 %v458_v33, %s550_s20  ;;  %v135_v24 = vrot.slane %v649_v30, 4  ;;  %v134_v25 = vrot.slane %v644_v29, 4 }
  0x8d   :  { %v168_v39 = vsel %vm63_vm1, %v436_v35, %v437_v34  ;;  %v169_v40 = vsel %vm63_vm1, %v437_v34, %v436_v35  ;;  %v667_v41 = vsel %vm607_vm2, %v580_v1, %v176_v36  ;;  %v672_v42 = vsel %vm611_vm3, %v588_v3, %v177_v37  ;;  %v445_v43 = vpop.permute.xlu1 %444  ;;  %v440_v47 = vpop.permute.xlu0 %439 }
  0x8e   :  { %v463_v44 = vpack.i.bf16 %v672_v42, %v667_v41  ;;  %v679_v45 = vsel %vm615_vm4, %v580_v1, %v169_v40  ;;  %v684_v46 = vsel %vm619_vm5, %v588_v3, %v168_v39  ;;  %v442_v48 = vunpack.i.h.bf16 %v440_v47 }
  0x8f   :  { %v441_v49 = vunpack.i.l.bf16 %v440_v47  ;;  %v473_v50 = vpack.i.bf16 %v684_v46, %v679_v45  ;;  %v447_v51 = vunpack.i.h.bf16 %v445_v43  ;;  %v446_v52 = vunpack.i.l.bf16 %v445_v43 }
  0x90   :  { %464 = vrot.lane.b32.xlu1 %v463_v44, %s550_s20  ;;  %469 = vrot.lane.b32.xlu0 %v468_v38, %s550_s20  ;;  %v243_v9 = vrot.slane %v672_v42, 4  ;;  %v242_v10 = vrot.slane %v667_v41, 4  ;;  %v727_v13 = vsel %vm150_vm8, %v584_v2, %v141_v60  ;;  %v733_v18 = vsel %vm150_vm8, %v578_v0, %v140_v62 }
  0x91   :  { %v115_v53 = vsel %vm105_vm6, %v442_v48, %v441_v49  ;;  %v217_v55 = vsel %vm105_vm6, %v447_v51, %v446_v52  ;;  %v450_v59 = vpop.permute.xlu0 %449  ;;  %v455_v61 = vpop.permute.xlu1 %454  ;;  %v114_v63 = vsel %vm105_vm6, %v441_v49, %v442_v48  ;;  %v720_v4 = vsel %vm105_vm6, %v446_v52, %v447_v51 }
  0x92   :  { %v697_v54 = vsel %vm54_vm7, %v584_v2, %v115_v53  ;;  %v704_v56 = vsel %vm54_vm7, %v588_v3, %v217_v55  ;;  %v452_v5 = vunpack.i.h.bf16 %v450_v59  ;;  %v451_v6 = vunpack.i.l.bf16 %v450_v59 }
  0x93   :  { %v457_v11 = vunpack.i.h.bf16 %v455_v61  ;;  %v456_v12 = vunpack.i.l.bf16 %v455_v61  ;;  %v146_v14 = vrot.slane %v114_v63, 4  ;;  %v147_v15 = vrot.slane %v697_v54, 4 }
  0x94   :  { %474 = vrot.lane.b32.xlu1 %v473_v50, %s550_s20  ;;  %479 = vrot.lane.b32.xlu0 %v468_v38, %s551_s21  ;;  %v248_v16 = vrot.slane %v720_v4, 4  ;;  %v249_v19 = vrot.slane %v704_v56, 4  ;;  %v90_v20 = vsel %vm51_vm9, %v452_v5, %v451_v6  ;;  %v740_v2 = vsel %vm150_vm8, %v588_v3, %v243_v9 }
  0x95   :  { %v744_v23 = vsel %vm150_vm8, %v580_v1, %v242_v10  ;;  %v89_v28 = vsel %vm51_vm9, %v451_v6, %v452_v5  ;;  %v193_v31 = vsel %vm51_vm9, %v457_v11, %v456_v12  ;;  %v763_v34 = vsel %vm51_vm9, %v456_v12, %v457_v11 }
  0x96   :  { %v129_v47 = vrot.slane %v89_v28, 4 }
  0x98   :  { %484 = vrot.lane.b32.xlu1 %v458_v33, %s551_s21  ;;  %489 = vrot.lane.b32.xlu0 %v473_v50, %s551_s21  ;;  %v759_v33 = vsel %vm51_vm9, %v578_v0, %v90_v20  ;;  %v771_v0 = vsel %vm51_vm9, %v580_v1, %v193_v31 }
  0x99   :  { %v128_v63 = vrot.slane %v759_v33, 4 }
  0x9c   :  { %494 = vrot.lane.b32.xlu1 %v463_v44, %s551_s21  ;;  %276 = vperm.xlu0 %498, %v273_v58  }
  0xfe   :  { %v460_v17 = vpop.permute.xlu0 %459 }
  0xff   :  { %v462_v21 = vunpack.i.h.bf16 %v460_v17  ;;  %v461_v22 = vunpack.i.l.bf16 %v460_v17 }
 0x101   :  { %v123_v32 = vsel %vm105_vm6, %v462_v21, %v461_v22  ;;  %v122_v3 = vsel %vm105_vm6, %v461_v22, %v462_v21 }
 0x102   :  { %v465_v35 = vpop.permute.xlu1 %464  ;;  %v470_v36 = vpop.permute.xlu0 %469  ;;  %v125_v37 = vsel %vm54_vm7, %v639_v27, %v123_v32  ;;  %v269_v38 = vpack.c.bf16 %v122_v3, %v122_v3 }
 0x103   :  { %v467_v39 = vunpack.i.h.bf16 %v465_v35  ;;  %v466_v40 = vunpack.i.l.bf16 %v465_v35  ;;  %v472_v43 = vunpack.i.h.bf16 %v470_v36  ;;  %v471_v44 = vunpack.i.l.bf16 %v470_v36 }
 0x104   :  { %v270_v48 = vpack.c.bf16 %v125_v37, %v125_v37  ;;  %v285_v49 = vsel %vm283_vm10, %v269_v38, 0 }
 0x105   :  { %v106_v50 = vsel %vm105_vm6, %v471_v44, %v472_v43  ;;  %v107_v27 = vsel %vm105_vm6, %v472_v43, %v471_v44  ;;  %v225_v51 = vsel %vm105_vm6, %v467_v39, %v466_v40  ;;  %v224_v52 = vsel %vm105_vm6, %v466_v40, %v467_v39 }
 0x106   :  { %404 = vmatprep.subr.msk.bf16.mxu0 %vm283_vm10, %v270_v48  ;;  %v475_v53 = vpop.permute.xlu1 %474  ;;  %v480_v1 = vpop.permute.xlu0 %479  ;;  %v227_v54 = vsel %vm54_vm7, %v672_v42, %v225_v51  ;;  %v271_v55 = vpack.c.bf16 %v224_v52, %v224_v52  ;;  %v109_v57 = vsel %vm54_vm7, %v649_v30, %v107_v27  ;;  %v157_v58 = vsel %vm150_vm8, %v106_v50, %v146_v14 }
 0x107   :  { %v477_v59 = vunpack.i.h.bf16 %v475_v53  ;;  %v476_v60 = vunpack.i.l.bf16 %v475_v53  ;;  %v482_v61 = vunpack.i.h.bf16 %v480_v1  ;;  %v481_v62 = vunpack.i.l.bf16 %v480_v1  ;;  %307 = vmatpush1.bf16.msra.mxu0 %v285_v49 }
 0x108   :  { %v272_v4 = vpack.c.bf16 %v227_v54, %v227_v54  ;;  %v291_v5 = vsel %vm283_vm10, %v271_v55, 0  ;;  %v158_v6 = vsel %vm150_vm8, %v109_v57, %v147_v15  ;;  %v265_v15 = vpack.c.bf16 %v157_v58, %v733_v18 }
 0x109   :  { %v208_v42 = vsel %vm105_vm6, %v476_v60, %v477_v59  ;;  %v209_v9 = vsel %vm105_vm6, %v477_v59, %v476_v60  ;;  %v81_v10 = vsel %vm51_vm9, %v481_v62, %v482_v61  ;;  %v82_v11 = vsel %vm51_vm9, %v482_v61, %v481_v62 }
 0x10a   :  { %406 = vmatprep.subr.msk.bf16.mxu1 %vm283_vm10, %v272_v4  ;;  %v485_v12 = vpop.permute.xlu1 %484  ;;  %v490_v14 = vpop.permute.xlu0 %489  ;;  %v266_v17 = vpack.c.bf16 %v158_v6, %v727_v13  ;;  %v211_v20 = vsel %vm54_vm7, %v684_v46, %v209_v9  ;;  %v258_v21 = vsel %vm150_vm8, %v208_v42, %v248_v16  ;;  %v152_v18 = vsel %vm150_vm8, %v81_v10, %v129_v47 }
 0x10b   :  { %348 = vmatpush1.bf16.msra.mxu1 %v291_v5  ;;  %v487_v22 = vunpack.i.h.bf16 %v485_v12  ;;  %v486_v28 = vunpack.i.l.bf16 %v485_v12  ;;  %v492_v31 = vunpack.i.h.bf16 %v490_v14  ;;  %v491_v32 = vunpack.i.l.bf16 %v490_v14 }
 0x10c   :  { %308 = vmatprep.subr.bf16.mxu0 %v266_v17  ;;  %v259_v3 = vsel %vm150_vm8, %v211_v20, %v249_v19  ;;  %v267_v13 = vpack.c.bf16 %v258_v21, %v744_v23  ;;  %v83_v8 = vsel %vm51_vm9, %v644_v29, %v82_v11  ;;  %v237_v30 = vrot.slane %v684_v46, 4  ;;  %v260_v46 = vld [vmem:[%s861_s1] sm:$0xf]  ;;  %s553_s1 = smov [#allocation5]  }
 0x10d   :  { %v97_v16 = vsel %vm51_vm9, %v486_v28, %v487_v22  ;;  %v98_v33 = vsel %vm51_vm9, %v487_v22, %v486_v28  ;;  %v184_v35 = vsel %vm51_vm9, %v491_v32, %v492_v31  ;;  %v185_v56 = vsel %vm51_vm9, %v492_v31, %v491_v32  ;;  %309 = vmatpush1.bf16.msra.mxu0 %v265_v15  ;;  %s392_s25 = sshll.u32 %s553_s1, 4  ;;  %s393_s25 = int_to_ptr.vmem [resolvable:$true] %s392_s25 }
 0x10e   :  { %v268_v19 = vpack.c.bf16 %v259_v3, %v740_v2  ;;  %v495_v23 = vpop.permute.xlu1 %494  ;;  %v154_v36 = vsel %vm150_vm8, %v97_v16, %v135_v24  ;;  %v99_v37 = vsel %vm51_vm9, %v634_v26, %v98_v33  ;;  %v151_v38 = vsel %vm150_vm8, %v83_v8, %v128_v63  ;;  %s521_s26 = scalar_lea.vmem %s393_s25, 512  ;;  %p526_p6 = scmp.lt.s32.totalorder %s393_s25, %s393_s25 }
 0x10f   :  { %v497_v39 = vunpack.i.h.bf16 %v495_v23  ;;  %v496_v40 = vunpack.i.l.bf16 %v495_v23  ;;  %v262_v43 = vpack.c.bf16 %v154_v36, %v152_v18  ;;  %v153_v44 = vsel %vm150_vm8, %v99_v37, %v134_v25  ;;  %p522_p5 = scmp.ne.s32.totalorder %s393_s25, %s521_s26  ;;  %p527_p7 = scmp.lt.s32.totalorder %s521_s26, %s521_s26 }
 0x110   :  { %v231_v2 = vrot.slane %v763_v34, 4  ;;  %349 = vmatprep.subr.bf16.mxu1 %v268_v19  ;;  %v261_v47 = vpack.c.bf16 %v153_v44, %v151_v38  ;;  %v186_v24 = vsel %vm51_vm9, %v679_v45, %v185_v56  ;;  %v230_v26 = vrot.slane %v771_v0, 4 }
 0x111   :  { %v200_v48 = vsel %vm51_vm9, %v496_v40, %v497_v39  ;;  %v201_v29 = vsel %vm51_vm9, %v497_v39, %v496_v40  ;;  %350 = vmatpush1.bf16.msra.mxu1 %v267_v13  ;;  %310 = vmatprep.subr.bf16.mxu0 %v262_v43  ;;  %v236_v25 = vrot.slane %v679_v45, 4  ;;  %p528_p8 = por %p527_p7, %p526_p6 }
 0x112   :  { %311 = vmatpush1.bf16.msra.mxu0 %v261_v47  ;;  %v253_v34 = vsel %vm150_vm8, %v184_v35, %v231_v2  ;;  %v255_v0 = vsel %vm150_vm8, %v200_v48, %v237_v30  ;;  %v202_v49 = vsel %vm51_vm9, %v667_v41, %v201_v29  ;;  %v252_v27 = vsel %vm150_vm8, %v186_v24, %v230_v26 }
 0x113   :  { %v264_v50 = vpack.c.bf16 %v255_v0, %v253_v34  ;;  %v254_v51 = vsel %vm150_vm8, %v202_v49, %v236_v25  ;;  %p529_p9 = pnand %p528_p8, %p522_p5 }
 0x114   :  { %v263_v45 = vpack.c.bf16 %v254_v51, %v252_v27 }
 0x115   :  { %405 = vmatmul.mubr.msk.bf16.vlgmr.msra.gmra.mxu0 %vm279_vm11, %v260_v46  ;;  %351 = vmatprep.subr.bf16.mxu1 %v264_v50 }
 0x116   :  { %352 = vmatpush1.bf16.msra.mxu1 %v263_v45 }
 0x117   :  { %v277_v52 = vpop.permute.xlu0 %276 }
 0x119   :  { %407 = vmatmul.mubr.msk.bf16.vlgmr.msra.gmra.mxu1 %vm279_vm11, %v260_v46 }
 0x1d5   :  { %v330_v53 = vpop.f32.mrf.mxu0 }
 0x1d6   :  { %v331_v1 = vadd.f32 %v330_v53, %v277_v52 }
 0x1d7   :  { %v332_v54 = vpop.f32.mrf.mxu0 }
 0x1d8   :  { %v333_v55 = vadd.f32 %v332_v54, %v277_v52  ;;  %v378_v57 = vmax.f32 %v331_v1, 0.0 }
 0x1d9   :  { %v334_v58 = vpop.f32.mrf.mxu0  ;;  %v371_v59 = vpop.f32.mrf.mxu1 }
 0x1da   :  { %v379_v7 = vmax.f32 %v333_v55, 0.0  ;;  %382 = vst [vmem:[#allocation5] sm:$0xff] %v378_v57  ;;  %v372_v41 = vadd.f32 %v371_v59, %v277_v52 }
 0x1db   :  { %v335_v60 = vpop.f32.mrf.mxu0  ;;  %v373_v61 = vpop.f32.mrf.mxu1 }
 0x1dc   :  { %383 = vst [vmem:[#allocation5 + $0x8] sm:$0xff] %v379_v7  ;;  %v380_v62 = vmax.f32 %v372_v41, 0.0  ;;  %v374_v63 = vadd.f32 %v373_v61, %v277_v52 }
 0x1dd   :  { %v375_v4 = vpop.f32.mrf.mxu1 }
 0x1de   :  { %385 = vst [vmem:[#allocation5 + $0x10] sm:$0xff] %v380_v62  ;;  %v381_v5 = vmax.f32 %v374_v63, 0.0 }
 0x1df   :  { %v376_v6 = vpop.f32.mrf.mxu1 }
 0x1e0   :  { %386 = vst [vmem:[#allocation5 + $0x18] sm:$0xff] %v381_v5 }
 0x1e1   :  { %532 = shalt.err (!%p529_p9)
}
 0x1e2   :  { %s554_s27 = smov 256  }
 0x1e3   :  { %398 = dma.vmem_to_hbm [thread:$0]  %s393_s25, 512, %s863_s3, [#allocation4], %s554_s27, %s554_s27, %s551_s21  }
 0x1e4   :  { %543 = dma.done.wait [#allocation4], 512  }
 0x1e5   :  { %544 = vsyncadd [#allocation4], 4294966784 }
 0x1e6   :  { %402 = vsyncpa [#allocation3], 1 }
 0x1e7   :  { %403 = vsyncpa [#allocation4], 1 }

</bundles_post_ra>
